<compile_context>
chip_gen: v7x
topology: tpu7x:2x2x1
jax: 0.10.0
libtpu: 0.0.40
codegen_flags: <defaults>
</compile_context>

<pallas_src>
import jax
import jax.numpy as jnp
from jax.experimental import pallas as pl
from jax.experimental.pallas import tpu as pltpu

KSIZE = 7  # spatial-attention kernel size


def _sigmoid(v):
    # Numerically stable sigmoid from basic ops (no inf intermediates).
    e = jnp.exp(-jnp.abs(v))
    return jnp.where(v >= 0, 1.0 / (1.0 + e), e / (1.0 + e))


def cbam_kernel(x_ref, w1_ref, w2_ref, a0_ref, a1_ref, o_ref):
    # x_ref : (C, P)   lane-dense input slab for this batch element, P = H*W
    # w1_ref: (Ch, C)  f1 1x1-conv weight (squeezed)
    # w2_ref: (C, Ch)  f2 1x1-conv weight (squeezed)
    # a0_ref: (P, P)   flattened 7x7 conv operator, avg channel
    # a1_ref: (P, P)   flattened 7x7 conv operator, max channel
    # o_ref : (C, P)   output slab
    C, P = x_ref.shape
    xv = x_ref[...].astype(jnp.float32)

    # ---------------- channel attention ----------------
    ap = jnp.sum(xv, axis=1, keepdims=True) * (1.0 / P)    # (C, 1) avg pool
    mp = jnp.max(xv, axis=1, keepdims=True)                # (C, 1) max pool

    def mlp(p):                                            # p: (C, 1)
        h = jnp.dot(w1_ref[...], p, preferred_element_type=jnp.float32)   # (Ch, 1)
        h = jnp.maximum(h, 0.0)                                           # ReLU
        return jnp.dot(w2_ref[...], h, preferred_element_type=jnp.float32)  # (C, 1)

    ca = _sigmoid(mlp(ap) + mlp(mp))                       # (C, 1)

    y = xv * ca                                            # channel-attended slab
    o_ref[...] = y.astype(o_ref.dtype)                     # write now; re-read later

    # ---------------- spatial attention ----------------
    avg_s = jnp.sum(y, axis=0, keepdims=True) * (1.0 / C)  # (1, P) mean over C
    max_s = jnp.max(y, axis=0, keepdims=True)              # (1, P) max over C

    # flattened 7x7 "same" conv as two MXU matmuls
    conv = (jnp.dot(avg_s, a0_ref[...], preferred_element_type=jnp.float32)
            + jnp.dot(max_s, a1_ref[...], preferred_element_type=jnp.float32))  # (1, P)
    sa = _sigmoid(conv)                                    # (1, P)

    o_ref[...] = (o_ref[...] * sa).astype(o_ref.dtype)


def _build_spatial_operator(sp_w, H, W):
    """Flatten the KxK 'same' conv into two dense (H*W, H*W) operators.

    conv_flat[p] = sum_q avg_flat[q] * A0[q, p] + max_flat[q] * A1[q, p]
    """
    K = sp_w.shape[-1]
    half = K // 2
    P = H * W
    pi = jnp.arange(P, dtype=jnp.int32) // W               # row of each flat index
    pj = jnp.arange(P, dtype=jnp.int32) % W                # col of each flat index
    di = pi[:, None] - pi[None, :] + half                  # (P, P): in_row - out_row + half
    dj = pj[:, None] - pj[None, :] + half
    valid = (di >= 0) & (di < K) & (dj >= 0) & (dj < K)
    di_c = jnp.clip(di, 0, K - 1)
    dj_c = jnp.clip(dj, 0, K - 1)
    a = sp_w[0][:, di_c, dj_c] * valid[None].astype(sp_w.dtype)   # (2, P, P)
    return a[0].astype(jnp.float32), a[1].astype(jnp.float32)


def cbam_forward(x, f1_w, f2_w, sp_w):
    """x: (B,C,H,W) f32; f1_w: (Ch,C); f2_w: (C,Ch); sp_w: (1,2,K,K)."""
    B, C, H, W = x.shape
    Ch = f1_w.shape[0]
    P = H * W

    x3 = x.reshape(B, C, P)                     # free row-major layout plumbing
    a0, a1 = _build_spatial_operator(sp_w, H, W)

    out3 = pl.pallas_call(
        cbam_kernel,
        out_shape=jax.ShapeDtypeStruct((B, C, P), x.dtype),
        grid=(B,),
        in_specs=[
            pl.BlockSpec((None, C, P), lambda b: (b, 0, 0)),
            pl.BlockSpec((Ch, C), lambda b: (0, 0)),
            pl.BlockSpec((C, Ch), lambda b: (0, 0)),
            pl.BlockSpec((P, P), lambda b: (0, 0)),
            pl.BlockSpec((P, P), lambda b: (0, 0)),
        ],
        out_specs=pl.BlockSpec((None, C, P), lambda b: (b, 0, 0)),
        compiler_params=pltpu.CompilerParams(
            dimension_semantics=("parallel",)),
    )(x3, f1_w.astype(jnp.float32), f2_w.astype(jnp.float32), a0, a1)

    return out3.reshape(B, C, H, W)


def cbam_ref(x, f1_w, f2_w, sp_w):
    """Pure-JAX reference matching the PyTorch module exactly."""
    avg = jnp.mean(x, axis=(2, 3))
    mx = jnp.max(x, axis=(2, 3))

    def mlp(p):
        h = jnp.maximum(p @ f1_w.T, 0.0)
        return h @ f2_w.T

    ca = jax.nn.sigmoid(mlp(avg) + mlp(mx))[:, :, None, None]
    y = ca * x
    avg_s = jnp.mean(y, axis=1, keepdims=True)
    max_s = jnp.max(y, axis=1, keepdims=True)
    s = jnp.concatenate([avg_s, max_s], axis=1)
    conv = jax.lax.conv_general_dilated(
        s, sp_w, window_strides=(1, 1), padding=((3, 3), (3, 3)),
        dimension_numbers=("NCHW", "OIHW", "NCHW"))
    sa = jax.nn.sigmoid(conv)
    return sa * y


if __name__ == "__main__":
    key = jax.random.PRNGKey(0)
    k1, k2, k3, k4 = jax.random.split(key, 4)

    B, C, H, W = 2, 32, 16, 16
    ratio = 16
    Ch = C // ratio            # = 2

    x = jax.random.normal(k1, (B, C, H, W), jnp.float32)
    f1_w = 0.2 * jax.random.normal(k2, (Ch, C), jnp.float32)       # Conv2d(C, C//r, 1).weight squeezed
    f2_w = 0.2 * jax.random.normal(k3, (C, Ch), jnp.float32)       # Conv2d(C//r, C, 1).weight squeezed
    sp_w = 0.1 * jax.random.normal(k4, (1, 2, KSIZE, KSIZE), jnp.float32)  # Conv2d(2, 1, 7).weight

    out = cbam_forward(x, f1_w, f2_w, sp_w)
    out = jax.block_until_ready(out)

    ref = cbam_ref(x, f1_w, f2_w, sp_w)
    assert out.shape == (B, C, H, W)
    err = float(jnp.max(jnp.abs(out - ref)))
    assert jnp.allclose(out, ref, atol=2e-4, rtol=2e-4), f"max abs err {err}"

    print("KERNEL_OK")
</pallas_src>

<mosaic_0001>
module attributes {stable_mosaic.version = 11 : i64} {
  func.func @cbam_kernel(%arg0: i32, %arg1: memref<1x32x256xf32, #tpu.memory_space<vmem>>, %arg2: memref<2x32xf32, #tpu.memory_space<vmem>>, %arg3: memref<32x2xf32, #tpu.memory_space<vmem>>, %arg4: memref<256x256xf32, #tpu.memory_space<vmem>>, %arg5: memref<256x256xf32, #tpu.memory_space<vmem>>, %arg6: memref<1x32x256xf32, #tpu.memory_space<vmem>>) attributes {dimension_semantics = [#tpu.dimension_semantics<parallel>], iteration_bounds = array<i64: 2>, scalar_prefetch = 0 : i64, scratch_operands = 0 : i64, tpu.core_type = #tpu.core_type<tc>, window_params = [{transform_indices = @transform_0, window_bounds = array<i64: 1, 32, 256>}, {pipeline_mode = #tpu.pipeline_mode<synchronous>, transform_indices = @transform_1, window_bounds = array<i64: 2, 32>}, {pipeline_mode = #tpu.pipeline_mode<synchronous>, transform_indices = @transform_2, window_bounds = array<i64: 32, 2>}, {pipeline_mode = #tpu.pipeline_mode<synchronous>, transform_indices = @transform_3, window_bounds = array<i64: 256, 256>}, {pipeline_mode = #tpu.pipeline_mode<synchronous>, transform_indices = @transform_4, window_bounds = array<i64: 256, 256>}, {transform_indices = @transform_5, window_bounds = array<i64: 1, 32, 256>}]} {
    %c0 = arith.constant 0 : index
    %c0_0 = arith.constant 0 : index
    %c0_1 = arith.constant 0 : index
    %0 = vector.load %arg1[%c0, %c0_0, %c0_1] : memref<1x32x256xf32, #tpu.memory_space<vmem>>, vector<1x32x256xf32>
    %1 = vector.shape_cast %0 : vector<1x32x256xf32> to vector<32x256xf32>
    %cst = arith.constant dense<0.000000e+00> : vector<32xf32>
    %2 = vector.multi_reduction <add>, %1, %cst [1] : vector<32x256xf32> to vector<32xf32>
    %3 = vector.shape_cast %2 : vector<32xf32> to vector<32x1xf32>
    %cst_2 = arith.constant 3.906250e-03 : f32
    %4 = vector.broadcast %cst_2 : f32 to vector<32x1xf32>
    %5 = arith.mulf %3, %4 : vector<32x1xf32>
    %cst_3 = arith.constant dense<0xFF800000> : vector<32xf32>
    %6 = vector.multi_reduction <maximumf>, %1, %cst_3 [1] : vector<32x256xf32> to vector<32xf32>
    %7 = vector.shape_cast %6 : vector<32xf32> to vector<32x1xf32>
    %c0_4 = arith.constant 0 : index
    %c0_5 = arith.constant 0 : index
    %8 = vector.load %arg2[%c0_4, %c0_5] : memref<2x32xf32, #tpu.memory_space<vmem>>, vector<2x32xf32>
    %cst_6 = arith.constant dense<0.000000e+00> : vector<2x1xf32>
    %9 = tpu.matmul %8, %5, %cst_6 {dimension_numbers = #tpu.dot_dimension_numbers<[1], [0], [0], [1], [0, 0, 1, 1], [], []>} : vector<2x32xf32>, vector<32x1xf32>, vector<2x1xf32> -> vector<2x1xf32>
    %cst_7 = arith.constant 0.000000e+00 : f32
    %10 = vector.broadcast %cst_7 : f32 to vector<2x1xf32>
    %11 = arith.maximumf %9, %10 : vector<2x1xf32>
    %c0_8 = arith.constant 0 : index
    %c0_9 = arith.constant 0 : index
    %12 = vector.load %arg3[%c0_8, %c0_9] : memref<32x2xf32, #tpu.memory_space<vmem>>, vector<32x2xf32>
    %cst_10 = arith.constant dense<0.000000e+00> : vector<32x1xf32>
    %13 = tpu.matmul %12, %11, %cst_10 {dimension_numbers = #tpu.dot_dimension_numbers<[1], [0], [0], [1], [0, 0, 1, 1], [], []>} : vector<32x2xf32>, vector<2x1xf32>, vector<32x1xf32> -> vector<32x1xf32>
    %c0_11 = arith.constant 0 : index
    %c0_12 = arith.constant 0 : index
    %14 = vector.load %arg2[%c0_11, %c0_12] : memref<2x32xf32, #tpu.memory_space<vmem>>, vector<2x32xf32>
    %cst_13 = arith.constant dense<0.000000e+00> : vector<2x1xf32>
    %15 = tpu.matmul %14, %7, %cst_13 {dimension_numbers = #tpu.dot_dimension_numbers<[1], [0], [0], [1], [0, 0, 1, 1], [], []>} : vector<2x32xf32>, vector<32x1xf32>, vector<2x1xf32> -> vector<2x1xf32>
    %cst_14 = arith.constant 0.000000e+00 : f32
    %16 = vector.broadcast %cst_14 : f32 to vector<2x1xf32>
    %17 = arith.maximumf %15, %16 : vector<2x1xf32>
    %c0_15 = arith.constant 0 : index
    %c0_16 = arith.constant 0 : index
    %18 = vector.load %arg3[%c0_15, %c0_16] : memref<32x2xf32, #tpu.memory_space<vmem>>, vector<32x2xf32>
    %cst_17 = arith.constant dense<0.000000e+00> : vector<32x1xf32>
    %19 = tpu.matmul %18, %17, %cst_17 {dimension_numbers = #tpu.dot_dimension_numbers<[1], [0], [0], [1], [0, 0, 1, 1], [], []>} : vector<32x2xf32>, vector<2x1xf32>, vector<32x1xf32> -> vector<32x1xf32>
    %20 = arith.addf %13, %19 : vector<32x1xf32>
    %21 = math.absf %20 : vector<32x1xf32>
    %cst_18 = arith.constant 0.000000e+00 : f32
    %22 = vector.broadcast %cst_18 : f32 to vector<32x1xf32>
    %23 = arith.subf %22, %21 : vector<32x1xf32>
    %24 = math.exp %23 : vector<32x1xf32>
    %cst_19 = arith.constant 0.000000e+00 : f32
    %25 = vector.broadcast %cst_19 : f32 to vector<32x1xf32>
    %26 = arith.cmpf oge, %20, %25 : vector<32x1xf32>
    %cst_20 = arith.constant 1.000000e+00 : f32
    %27 = vector.broadcast %cst_20 : f32 to vector<32x1xf32>
    %28 = arith.addf %27, %24 : vector<32x1xf32>
    %cst_21 = arith.constant 1.000000e+00 : f32
    %29 = vector.broadcast %cst_21 : f32 to vector<32x1xf32>
    %30 = arith.divf %29, %28 : vector<32x1xf32>
    %cst_22 = arith.constant 1.000000e+00 : f32
    %31 = vector.broadcast %cst_22 : f32 to vector<32x1xf32>
    %32 = arith.addf %31, %24 : vector<32x1xf32>
    %33 = arith.divf %24, %32 : vector<32x1xf32>
    %34 = arith.select %26, %30, %33 : vector<32x1xi1>, vector<32x1xf32>
    %35 = vector.broadcast %34 : vector<32x1xf32> to vector<32x256xf32>
    %36 = arith.mulf %1, %35 : vector<32x256xf32>
    %c0_23 = arith.constant 0 : index
    %c0_24 = arith.constant 0 : index
    %c0_25 = arith.constant 0 : index
    %37 = vector.load %arg6[%c0_23, %c0_24, %c0_25] : memref<1x32x256xf32, #tpu.memory_space<vmem>>, vector<1x32x256xf32>
    %38 = vector.shape_cast %37 : vector<1x32x256xf32> to vector<32x256xf32>
    %39 = vector.shape_cast %36 : vector<32x256xf32> to vector<1x32x256xf32>
    tpu.vector_store %arg6[%c0_23, %c0_24, %c0_25], %39 {strides = array<i32>} : memref<1x32x256xf32, #tpu.memory_space<vmem>>, vector<1x32x256xf32>,
    %cst_26 = arith.constant dense<0.000000e+00> : vector<256xf32>
    %40 = vector.multi_reduction <add>, %36, %cst_26 [0] : vector<32x256xf32> to vector<256xf32>
    %41 = vector.shape_cast %40 : vector<256xf32> to vector<1x256xf32>
    %cst_27 = arith.constant 3.125000e-02 : f32
    %42 = vector.broadcast %cst_27 : f32 to vector<1x256xf32>
    %43 = arith.mulf %41, %42 : vector<1x256xf32>
    %cst_28 = arith.constant dense<0xFF800000> : vector<256xf32>
    %44 = vector.multi_reduction <maximumf>, %36, %cst_28 [0] : vector<32x256xf32> to vector<256xf32>
    %45 = vector.shape_cast %44 : vector<256xf32> to vector<1x256xf32>
    %c0_29 = arith.constant 0 : index
    %c0_30 = arith.constant 0 : index
    %46 = vector.load %arg4[%c0_29, %c0_30] : memref<256x256xf32, #tpu.memory_space<vmem>>, vector<256x256xf32>
    %cst_31 = arith.constant dense<0.000000e+00> : vector<1x256xf32>
    %47 = tpu.matmul %43, %46, %cst_31 {dimension_numbers = #tpu.dot_dimension_numbers<[1], [0], [0], [1], [0, 0, 1, 1], [], []>} : vector<1x256xf32>, vector<256x256xf32>, vector<1x256xf32> -> vector<1x256xf32>
    %c0_32 = arith.constant 0 : index
    %c0_33 = arith.constant 0 : index
    %48 = vector.load %arg5[%c0_32, %c0_33] : memref<256x256xf32, #tpu.memory_space<vmem>>, vector<256x256xf32>
    %cst_34 = arith.constant dense<0.000000e+00> : vector<1x256xf32>
    %49 = tpu.matmul %45, %48, %cst_34 {dimension_numbers = #tpu.dot_dimension_numbers<[1], [0], [0], [1], [0, 0, 1, 1], [], []>} : vector<1x256xf32>, vector<256x256xf32>, vector<1x256xf32> -> vector<1x256xf32>
    %50 = arith.addf %47, %49 : vector<1x256xf32>
    %51 = math.absf %50 : vector<1x256xf32>
    %cst_35 = arith.constant 0.000000e+00 : f32
    %52 = vector.broadcast %cst_35 : f32 to vector<1x256xf32>
    %53 = arith.subf %52, %51 : vector<1x256xf32>
    %54 = math.exp %53 : vector<1x256xf32>
    %cst_36 = arith.constant 0.000000e+00 : f32
    %55 = vector.broadcast %cst_36 : f32 to vector<1x256xf32>
    %56 = arith.cmpf oge, %50, %55 : vector<1x256xf32>
    %cst_37 = arith.constant 1.000000e+00 : f32
    %57 = vector.broadcast %cst_37 : f32 to vector<1x256xf32>
    %58 = arith.addf %57, %54 : vector<1x256xf32>
    %cst_38 = arith.constant 1.000000e+00 : f32
    %59 = vector.broadcast %cst_38 : f32 to vector<1x256xf32>
    %60 = arith.divf %59, %58 : vector<1x256xf32>
    %cst_39 = arith.constant 1.000000e+00 : f32
    %61 = vector.broadcast %cst_39 : f32 to vector<1x256xf32>
    %62 = arith.addf %61, %54 : vector<1x256xf32>
    %63 = arith.divf %54, %62 : vector<1x256xf32>
    %64 = arith.select %56, %60, %63 : vector<1x256xi1>, vector<1x256xf32>
    %c0_40 = arith.constant 0 : index
    %c0_41 = arith.constant 0 : index
    %c0_42 = arith.constant 0 : index
    %65 = vector.load %arg6[%c0_40, %c0_41, %c0_42] : memref<1x32x256xf32, #tpu.memory_space<vmem>>, vector<1x32x256xf32>
    %66 = vector.shape_cast %65 : vector<1x32x256xf32> to vector<32x256xf32>
    %67 = vector.broadcast %64 : vector<1x256xf32> to vector<32x256xf32>
    %68 = arith.mulf %66, %67 : vector<32x256xf32>
    %c0_43 = arith.constant 0 : index
    %c0_44 = arith.constant 0 : index
    %c0_45 = arith.constant 0 : index
    %69 = vector.load %arg6[%c0_43, %c0_44, %c0_45] : memref<1x32x256xf32, #tpu.memory_space<vmem>>, vector<1x32x256xf32>
    %70 = vector.shape_cast %69 : vector<1x32x256xf32> to vector<32x256xf32>
    %71 = vector.shape_cast %68 : vector<32x256xf32> to vector<1x32x256xf32>
    tpu.vector_store %arg6[%c0_43, %c0_44, %c0_45], %71 {strides = array<i32>} : memref<1x32x256xf32, #tpu.memory_space<vmem>>, vector<1x32x256xf32>,
    return
  }
  func.func @transform_0(%arg0: i32) -> (i32, i32, i32) {
    %c0_i32 = arith.constant 0 : i32
    %c0_i32_0 = arith.constant 0 : i32
    %c0_i32_1 = arith.constant 0 : i32
    return %arg0, %c0_i32, %c0_i32_0 : i32, i32, i32
  }
  func.func @transform_1(%arg0: i32) -> (i32, i32) {
    %c0_i32 = arith.constant 0 : i32
    %c0_i32_0 = arith.constant 0 : i32
    %c0_i32_1 = arith.constant 0 : i32
    return %c0_i32, %c0_i32_0 : i32, i32
  }
  func.func @transform_2(%arg0: i32) -> (i32, i32) {
    %c0_i32 = arith.constant 0 : i32
    %c0_i32_0 = arith.constant 0 : i32
    %c0_i32_1 = arith.constant 0 : i32
    return %c0_i32, %c0_i32_0 : i32, i32
  }
  func.func @transform_3(%arg0: i32) -> (i32, i32) {
    %c0_i32 = arith.constant 0 : i32
    %c0_i32_0 = arith.constant 0 : i32
    %c0_i32_1 = arith.constant 0 : i32
    return %c0_i32, %c0_i32_0 : i32, i32
  }
  func.func @transform_4(%arg0: i32) -> (i32, i32) {
    %c0_i32 = arith.constant 0 : i32
    %c0_i32_0 = arith.constant 0 : i32
    %c0_i32_1 = arith.constant 0 : i32
    return %c0_i32, %c0_i32_0 : i32, i32
  }
  func.func @transform_5(%arg0: i32) -> (i32, i32, i32) {
    %c0_i32 = arith.constant 0 : i32
    %c0_i32_0 = arith.constant 0 : i32
    %c0_i32_1 = arith.constant 0 : i32
    return %arg0, %c0_i32, %c0_i32_0 : i32, i32, i32
  }
}

</mosaic_0001>

<bundles_post_ra>
// kernel: tpu_custom_call.1
= control target key start
LH: loop header
LB: loop body
LE: loop exit
PB: predicated region body
PF: predicated region fallthrough
CT: control target
= control target key end

     0   :  { %10 = vsyncpa [#allocation3], 0  ;;  %s2086_s0 = inlined_call_operand.hbm [shape: f32[2,32,256], index: 0, kind: input, shape index: {}]   ;;  %s2087_s1 = inlined_call_operand.vmem [shape: f32[2,32], index: 1, kind: input, shape index: {}]   ;;  %s2088_s2 = inlined_call_operand.vmem [shape: f32[32,2], index: 2, kind: input, shape index: {}]   ;;  %s2089_s3 = inlined_call_operand.hbm [shape: f32[256,256], index: 3, kind: input, shape index: {}]   ;;  %s2090_s4 = inlined_call_operand.hbm [shape: f32[256,256], index: 4, kind: input, shape index: {}]   ;;  %s2091_s5 = inlined_call_operand.hbm [shape: f32[2,32,256], index: 5, kind: output, shape index: {}]  }
   0x1   :  { %12 = vsyncpa [#allocation3 + $0x1], 0 }
   0x2   :  { %13 = vsyncpa [#allocation6], 0 }
   0x3   :  { %14 = vsyncpa [#allocation4], 0 }
   0x4   :  { %16 = vsyncpa [#allocation4 + $0x1], 0  ;;  %s1728_s18 = smov 0   ;;  %s1730_s19 = smov 0  }
   0x5   :  { %s1732_s20 = smov 0   ;;  %s1734_s21 = smov 0  }
   0x6 LB: > { %s1749_s22 = sadd.s32 4294967295, %s1684_s21   ;;  %s1191_s23 = sadd.s32 4294967294, %s1684_s21   ;;  %s1684_s21 = sphi %s1734_s21, %s2111_s21   ;;  %s1680_s20 = sphi %s1732_s20, %s2110_s20   ;;  %s1676_s19 = sphi %s1730_s19, %s2109_s19   ;;  %s1672_s18 = sphi %s1728_s18, %s2108_s18  }
   0x7   : > { %p42_p0 = scmp.ne.s32.totalorder %s1676_s19, %s1672_s18  ;;  %p2092_p1 = scmp.eq.s32.totalorder %s1749_s22, 0 }
   0x8   : > { %p156_p3 = scmp.eq.s32.totalorder %s1191_s23, 1  ;;  %p1192_p5 = scmp.ge.s32.totalorder %s1684_s21, 1 }
   0x9   : > { %p1758_p4 = por %p2092_p1, %p42_p0  ;;  %p163_p7 = scmp.lt.s32.totalorder %s1684_s21, 3 }
   0xa   : > { %p1763_p6 = por %p156_p3, %p42_p0  ;;  %s1686_s27 = smov [#allocation5]  }
   0xb   : > { %s2095_s24 = scalar_select %p1758_p4, 1, 0 }
   0xc   : > { %s2096_s25 = scalar_select %p1763_p6, 1, 0 }
   0xd   : > { %p1768_p8 = pnand %p1192_p5, %p163_p7  ;;  %s181_s28 = sshll.u32 %s1686_s27, 4  ;;  %s1772_s28 = int_to_ptr.vmem [resolvable:$true] %s181_s28 }
   0xe   : > { %s1687_s30 = smov [#allocation7]   ;;  %s1528_s9 = scalar_lea.hbm %s2089_s3, 8192 }
   0xf   : > { %p1439_p9 = pneg %p1768_p8  ;;  %s194_s6 = sshll.u32 %s1687_s30, 4  ;;  %s1783_s6 = int_to_ptr.vmem [resolvable:$true] %s194_s6 }
  0x10   : > { %p1529_p12 = scmp.ne.s32.totalorder %s2089_s3, %s1528_s9  ;;  %p1535_p5 = scmp.lt.u32.totalorder %s1528_s9, %s2089_s3 }
  0x11   : > { %p1779_p11 = pnand %p1439_p9, %p2092_p1 }
  0x13   : > { %p1530_p13 = pneg %p1779_p11 }
  0x15   : > { %p1531_p0 = pnand %p1530_p13, %p1529_p12 }
  0x17   : > { %p1532_p3 = pneg %p1531_p0 }
  0x19   : > { %p1537_p7 = pnand %p1535_p5, %p1532_p3 }
  0x1b   : > { %1540 = shalt.err (!%p1537_p7)
}
  0x1c   : > { %s1541_s14 = scalar_lea.vmem %s1772_s28, 8192  ;;  %p1549_p2 = scmp.lt.s32.totalorder %s1772_s28, %s1772_s28 }
  0x1d   : > { %p1542_p9 = scmp.ne.s32.totalorder %s1772_s28, %s1541_s14  ;;  %p1550_p12 = scmp.lt.s32.totalorder %s1541_s14, %s1541_s14 }
  0x1f   : > { %p1544_p10 = pnand %p1542_p9, %p1530_p13  ;;  %p1551_p0 = por %p1550_p12, %p1549_p2 }
  0x21   : > { %p1545_p1 = pneg %p1544_p10 }
  0x23   : > { %p1552_p6 = pnand %p1551_p0, %p1545_p1 }
  0x25   : > { %1555 = shalt.err (!%p1552_p6)
}
  0x26   : > { %s1688_s15 = smov 256   ;;  %s1689_s16 = smov 16  }
  0x27   : > { %1442 = dma.hbm_to_vmem [thread:$0]  (!%p1779_p11), %s2089_s3, 8192, %s1772_s28, [#allocation6], %s1688_s15, %s1688_s15, %s1689_s16  }
  0x28   : > { %s1556_s7 = scalar_lea.hbm %s2090_s4, 8192 }
  0x29   : > { %p1557_p1 = scmp.ne.s32.totalorder %s2090_s4, %s1556_s7  ;;  %p1563_p10 = scmp.lt.u32.totalorder %s1556_s7, %s2090_s4 }
  0x2b   : > { %p1559_p2 = pnand %p1557_p1, %p1530_p13 }
  0x2d   : > { %p1560_p6 = pneg %p1559_p2 }
  0x2f   : > { %p1565_p3 = pnand %p1563_p10, %p1560_p6 }
  0x31   : > { %1568 = shalt.err (!%p1565_p3)
}
  0x32   : > { %s1569_s28 = scalar_lea.vmem %s1783_s6, 8192  ;;  %p1577_p12 = scmp.lt.s32.totalorder %s1783_s6, %s1783_s6 }
  0x33   : > { %p1570_p5 = scmp.ne.s32.totalorder %s1783_s6, %s1569_s28  ;;  %p1578_p0 = scmp.lt.s32.totalorder %s1569_s28, %s1569_s28 }
  0x35   : > { %p1572_p7 = pnand %p1570_p5, %p1530_p13  ;;  %p1579_p1 = por %p1578_p0, %p1577_p12 }
  0x37   : > { %p1573_p9 = pneg %p1572_p7 }
  0x39   : > { %p1580_p2 = pnand %p1579_p1, %p1573_p9 }
  0x3b   : > { %1583 = shalt.err (!%p1580_p2)
}
  0x3c   : > { %1445 = dma.hbm_to_vmem [thread:$0]  (!%p1779_p11), %s2090_s4, 8192, %s1783_s6, [#allocation6], %s1688_s15, %s1688_s15, %s1689_s16  }
  0x3d   : > { %s1844_s29 = sadd.s32 1, %s1684_s21   ;;  %s29_s14 = sadd.s32 1, %s1680_s20 }
  0x3e   : > { %s26_s17 = ssub.s32 %s1684_s21, %s1844_s29  ;;  %p36_p13 = scmp.ne.s32.totalorder %s1680_s20, %s1676_s19 }
  0x3f   : > { %p27_p6 = scmp.eq.s32.totalorder %s26_s17, 0  ;;  %p37_p10 = scmp.eq.s32.totalorder %s1684_s21, 0 }
  0x40   : > { %p2099_p3 = scmp.eq.s32.totalorder %s1749_s22, 1  ;;  %p1456_p7 = scmp.lt.s32.totalorder %s1684_s21, 2 }
  0x41   : > { %s1860_s27 = scalar_select %p27_p6, %s1680_s20, %s29_s14  }
  0x42   : > { %p1854_p5 = por %p2099_p3, %p36_p13  ;;  %p38_p9 = por %p37_p10, %p36_p13 }
  0x43   : > { %s208_s30 = sand.u32 1, %s1680_s20   ;;  %s1221_s6 = sshll.u32 %s1684_s21, 10 }
  0x44   : > { %s2100_s23 = scalar_select %p1854_p5, 1, 0 }
  0x45   : > { %s1196_s7 = sshll.u32 %s208_s30, 6  ;;  %s1867_s10 = scalar_lea.hbm %s2086_s0, %s1221_s6 }
  0x46   : > { %s212_s11 = scalar_lea.vmem [#allocation2], %s1196_s7  ;;  %p1871_p11 = pnand %p1456_p7, %p38_p9 }
  0x47   : > { %s219_s28 = sshll.u32 %s212_s11, 4  ;;  %s1875_s13 = scalar_lea.sflag [#allocation3], %s208_s30  ;;  %s1869_s28 = int_to_ptr.vmem [resolvable:$true] %s219_s28 }
  0x48   : > { %s1584_s14 = scalar_lea.hbm %s1867_s10, 1024  ;;  %p1586_p0 = pneg %p1871_p11 }
  0x49   : > { %p1585_p12 = scmp.ne.s32.totalorder %s1867_s10, %s1584_s14  ;;  %s1589_s6 = scalar_lea.hbm %s2086_s0, 2048 }
  0x4a   : > { %p1590_p13 = scmp.lt.u32.totalorder %s1867_s10, %s2086_s0  ;;  %p1591_p6 = scmp.lt.u32.totalorder %s1589_s6, %s1584_s14 }
  0x4b   : > { %p1587_p1 = pnand %p1586_p0, %p1585_p12  ;;  %p1593_p3 = scmp.lt.u32.totalorder %s1584_s14, %s1867_s10 }
  0x4c   : > { %p1592_p10 = por %p1591_p6, %p1590_p13 }
  0x4d   : > { %p1588_p2 = pneg %p1587_p1 }
  0x4e   : > { %p1594_p7 = por %p1593_p3, %p1592_p10 }
  0x50   : > { %p1595_p9 = pnand %p1594_p7, %p1588_p2 }
  0x52   : > { %1598 = shalt.err (!%p1595_p9)
}
  0x53   : > { %s1599_s30 = scalar_lea.vmem %s1869_s28, 1024  ;;  %s1690_s11 = smov [#allocation2]  }
  0x54   : > { %p1600_p12 = scmp.ne.s32.totalorder %s1869_s28, %s1599_s30  ;;  %s1604_s17 = sshll.u32 %s1690_s11, 4  ;;  %s1605_s17 = int_to_ptr.vmem [resolvable:$false] %s1604_s17 }
  0x55   : > { %s1606_s7 = scalar_lea.vmem %s1605_s17, 2048  ;;  %p1607_p4 = scmp.lt.s32.totalorder %s1869_s28, %s1605_s17 }
  0x56   : > { %p1602_p1 = pnand %p1600_p12, %p1586_p0  ;;  %p1608_p13 = scmp.lt.s32.totalorder %s1606_s7, %s1599_s30 }
  0x58   : > { %p1603_p5 = pneg %p1602_p1  ;;  %p1609_p6 = por %p1608_p13, %p1607_p4 }
  0x5a   : > { %p1610_p10 = pnand %p1609_p6, %p1603_p5 }
  0x5c   : > { %1613 = shalt.err (!%p1610_p10)
}
  0x5d   : > { %1449 = dma.hbm_to_vmem [thread:$0]  (!%p1871_p11), %s1867_s10, 1024, %s1869_s28, %s1875_s13, %s1688_s15, %s1688_s15, %s1689_s16  }
  0x5e   : > { %231 = sbr.rel (%p1768_p8) target bundleno = 1155 (0x483), region = 40  ;;  %s1909_s14 = sand.u32 (!%p1768_p8), 1, %s1676_s19  }
  0x5f   : > { %s1200_s6 = sshll.u32 (!%p1768_p8), %s1909_s14, 6  ;;  %s234_s8 = scalar_lea.sflag (!%p1768_p8), [#allocation3], %s1909_s14 }
  0x60   : > { %s237_s12 = scalar_lea.vmem (!%p1768_p8), [#allocation2], %s1200_s6  ;;  %p2102_p4 = scmp.ne.s32.totalorder (!%p1768_p8), %s2095_s24, 0 }
  0x65   : > { %1659 = dma.done.wait (%p2102_p4), %s234_s8, 1024  }
  0x66   : > { %1661 = vsyncadd (%p2102_p4), %s234_s8, 4294966272  ;;  %p2103_p5 = scmp.eq.s32.totalorder %s1749_s22, 0 }
  0x68   : > { %1663 = dma.done.wait (%p2103_p5), [#allocation6], 16384   ;;  %p2104_p8 = pmov %p2103_p5 }
  0x69   : > { %v1923_v0 = vld [vmem:[%s237_s12] sm:$0xff]  ;;  %v1925_v1 = vld [vmem:[%s237_s12 + $0x8] sm:$0xff]  ;;  %v1927_v2 = vld [vmem:[%s237_s12 + $0x10] sm:$0xff]  ;;  %v1691_v16 = vmov 0.0|0.0   ;;  %vm1692_vm0 = vmmov 0   ;;  %v1693_v17 = vmov 0.0  }
  0x6a   : > { %1665 = vsyncadd (%p2104_p8), [#allocation6], 4294950912  ;;  %v296_v3 = vmax.f32 %v1923_v0, %v1925_v1  ;;  %v280_v4 = vadd.f32 %v1925_v1, %v1923_v0  ;;  %v1933_v5 = vld [vmem:[%s237_s12 + $0x18] sm:$0xff]  ;;  %v1939_v8 = vld [vmem:[%s237_s12 + $0x30] sm:$0xff]  ;;  %1287 = vmatprep.subr.bf16.mxu1 %v1691_v16  ;;  %1281 = vmatprep.subr.bf16.mxu0 %v1691_v16  ;;  %vm309_vm1 = vcmask 261120   ;;  %vm459_vm2 = vcmask 15360  }
  0x6b   : > { %v299_v6 = vmax.f32 %v1927_v2, %v1933_v5  ;;  %v283_v7 = vadd.f32 %v1933_v5, %v1927_v2  ;;  %v1941_v9 = vld [vmem:[%s237_s12 + $0x38] sm:$0xff]  ;;  %v1943_v10 = vld [vmem:[%s237_s12 + $0x20] sm:$0xff]  ;;  %v1945_v11 = vld [vmem:[%s237_s12 + $0x28] sm:$0xff]  ;;  %1251 = vmatprep.mubr.msk.f32.mxu0 %vm1692_vm0, %v1693_v17  ;;  %1262 = vmatprep.mubr.msk.f32.mxu1 %vm1692_vm0, %v1693_v17  ;;  %vm472_vm3 = vcmask 1041408   ;;  %v1694_v45 = vmov 0   ;;  %s1222_s17 = sshll.u32 %s1749_s22, 10 }
  0x6c   : > { %297 = vmax.xlane.f32.xlu1 %v296_v3  ;;  %281 = vadd.xlane.f32.xlu0 %v280_v4  ;;  %v289_v12 = vadd.f32 %v1941_v9, %v1939_v8  ;;  %v286_v13 = vadd.f32 %v1945_v11, %v1943_v10  ;;  %v305_v14 = vmax.f32 %v1939_v8, %v1941_v9  ;;  %v308_v34 = vld [vmem:[%s2087_s1] sm:$0x3]  ;;  %v385_v40 = vld [vmem:[%s2088_s2 + $0x8] sm:$0xff]  ;;  %v386_v43 = vld [vmem:[%s2088_s2 + $0x10] sm:$0xff]  ;;  %s271_s7 = scalar_lea.vmem [#allocation8], %s1200_s6  ;;  %s2036_s26 = scalar_lea.hbm %s2091_s5, %s1222_s17 }
  0x6d   : > { %v302_v15 = vmax.f32 %v1943_v10, %v1945_v11  ;;  %v384_v35 = vld [vmem:[%s2088_s2] sm:$0xff]  ;;  %v387_v44 = vld [vmem:[%s2088_s2 + $0x18] sm:$0xff]  ;;  %1503 = vset.pattern.permute.xlu1 %v1694_v45  ;;  %1502 = vset.pattern.permute.xlu0 %v1694_v45  ;;  %v828_v46 = vld [vmem:[#allocation7 + $0x8] sm:$0xff]  ;;  %s1099_s8 = sshll.u32 %s271_s7, 4  ;;  %s1086_s22 = scalar_lea.sflag [#allocation4], %s1909_s14  ;;  %s2038_s8 = int_to_ptr.vmem [resolvable:$true] %s1099_s8 }
  0x6e   : > { %v830_v47 = vld [vmem:[#allocation7 + $0x18] sm:$0xff]  ;;  %v764_v48 = vld [vmem:[#allocation5 + $0x8] sm:$0xff]  ;;  %v827_v51 = vld [vmem:[#allocation7] sm:$0xff]  ;;  %s1614_s6 = scalar_lea.vmem %s2038_s8, 1024  ;;  %p2105_p0 = scmp.ne.s32.totalorder %s2100_s23, 0 }
  0x6f   : > { %v1293_v49 = vpack.c.bf16 %v830_v47, %v828_v46  ;;  %v766_v50 = vld [vmem:[#allocation5 + $0x18] sm:$0xff]  ;;  %v829_v52 = vld [vmem:[#allocation7 + $0x10] sm:$0xff]  ;;  %v763_v55 = vld [vmem:[#allocation5] sm:$0xff]  ;;  %p1615_p11 = scmp.ne.s32.totalorder %s2038_s8, %s1614_s6  ;;  %s1695_s15 = smov [#allocation8]  }
  0x70   : > { %300 = vmax.xlane.f32.xlu1 %v299_v6  ;;  %284 = vadd.xlane.f32.xlu0 %v283_v7  ;;  %v1357_v53 = vpack.c.bf16 %v766_v50, %v764_v48  ;;  %v1295_v54 = vpack.c.bf16 %v829_v52, %v827_v51  ;;  %v765_v56 = vld [vmem:[#allocation5 + $0x10] sm:$0xff]  ;;  %v832_v57 = vld [vmem:[#allocation7 + $0x28] sm:$0xff]  ;;  %v834_v59 = vld [vmem:[#allocation7 + $0x38] sm:$0xff]  ;;  %s1618_s16 = sshll.u32 %s1695_s15, 4  ;;  %s1619_s16 = int_to_ptr.vmem [resolvable:$false] %s1618_s16 }
  0x71   : > { %v1359_v58 = vpack.c.bf16 %v765_v56, %v763_v55  ;;  %v768_v60 = vld [vmem:[#allocation5 + $0x28] sm:$0xff]  ;;  %v770_v61 = vld [vmem:[#allocation5 + $0x38] sm:$0xff]  ;;  %v1297_v62 = vpack.c.bf16 %v834_v59, %v832_v57  ;;  %v831_v3 = vld [vmem:[#allocation7 + $0x20] sm:$0xff]  ;;  %p1616_p2 = pnand %p1615_p11, %p2105_p0  ;;  %s1620_s10 = scalar_lea.vmem %s1619_s16, 2048 }
  0x72   : > { %v1361_v63 = vpack.c.bf16 %v770_v61, %v768_v60  ;;  %v833_v4 = vld [vmem:[#allocation7 + $0x30] sm:$0xff]  ;;  %v767_v6 = vld [vmem:[#allocation5 + $0x20] sm:$0xff]  ;;  %v772_v17 = vld [vmem:[#allocation5 + $0x48] sm:$0xff]  ;;  %p1621_p7 = scmp.lt.s32.totalorder %s2038_s8, %s1619_s16  ;;  %p1622_p9 = scmp.lt.s32.totalorder %s1620_s10, %s1614_s6 }
  0x73   : > { %v1299_v7 = vpack.c.bf16 %v833_v4, %v831_v3  ;;  %v779_v45 = vld [vmem:[#allocation5 + $0x80] sm:$0xff]  ;;  %v781_v47 = vld [vmem:[#allocation5 + $0x90] sm:$0xff]  ;;  %v848_v48 = vld [vmem:[#allocation7 + $0xa8] sm:$0xff]  ;;  %p1617_p3 = pneg %p1616_p2 }
  0x74   : > { %290 = vadd.xlane.f32.xlu1 %v289_v12  ;;  %287 = vadd.xlane.f32.xlu0 %v286_v13  ;;  %v769_v12 = vld [vmem:[#allocation5 + $0x30] sm:$0xff]  ;;  %v836_v13 = vld [vmem:[#allocation7 + $0x48] sm:$0xff]  ;;  %v786_v51 = vld [vmem:[#allocation5 + $0xb8] sm:$0xff]  ;;  %p1623_p12 = por %p1622_p9, %p1621_p7 }
  0x75   : > { %v784_v50 = vld [vmem:[#allocation5 + $0xa8] sm:$0xff]  ;;  %v847_v55 = vld [vmem:[#allocation7 + $0xa0] sm:$0xff]  ;;  %v849_v56 = vld [vmem:[#allocation7 + $0xb0] sm:$0xff] }
  0x76   : > { %v783_v57 = vld [vmem:[#allocation5 + $0xa0] sm:$0xff]  ;;  %v785_v59 = vld [vmem:[#allocation5 + $0xb0] sm:$0xff]  ;;  %v852_v60 = vld [vmem:[#allocation7 + $0xc8] sm:$0xff]  ;;  %v1315_v3 = vpack.c.bf16 %v849_v56, %v847_v55  ;;  %p1624_p1 = pnand %p1623_p12, %p1617_p3 }
  0x77   : > { %v854_v61 = vld [vmem:[#allocation7 + $0xd8] sm:$0xff]  ;;  %v1379_v4 = vpack.c.bf16 %v785_v59, %v783_v57 }
  0x78   : > { %306 = vmax.xlane.f32.xlu1 %v305_v14  ;;  %303 = vmax.xlane.f32.xlu0 %v302_v15  ;;  %v838_v14 = vld [vmem:[#allocation7 + $0x58] sm:$0xff]  ;;  %v1363_v15 = vpack.c.bf16 %v769_v12, %v767_v6  ;;  %v1317_v6 = vpack.c.bf16 %v854_v61, %v852_v60  ;;  %v853_v12 = vld [vmem:[#allocation7 + $0xd0] sm:$0xff] }
  0xf9   : > { %v298_v18 = vpop.xlane.xlu1 %297  ;;  %v282_v19 = vpop.xlane.xlu0 %281 }
  0xfa   : > { %v292_v22 = vmul.f32 0.00390625, %v282_v19  ;;  %v835_v19 = vld [vmem:[#allocation7 + $0x40] sm:$0xff] }
  0xfd   : > { %v301_v20 = vpop.xlane.xlu1 %300  ;;  %v285_v21 = vpop.xlane.xlu0 %284 }
  0xfe   : > { %v1288_v23 = vpack.c.bf16 %v301_v20, %v298_v18  ;;  %v293_v24 = vmul.f32 0.00390625, %v285_v21  ;;  %v774_v18 = vld [vmem:[#allocation5 + $0x58] sm:$0xff]  ;;  %v837_v21 = vld [vmem:[#allocation7 + $0x50] sm:$0xff] }
  0xff   : > { %v1365_v20 = vpack.c.bf16 %v774_v18, %v772_v17  ;;  %v858_v17 = vld [vmem:[#allocation7 + $0xf8] sm:$0xff]  ;;  %v792_v18 = vld [vmem:[#allocation5 + $0xe8] sm:$0xff] }
 0x100   : > { %1289 = vmatpush3.bf16.msra.mxu1 %v1288_v23  ;;  %v1282_v25 = vpack.c.bf16 %v293_v24, %v292_v22  ;;  %v771_v22 = vld [vmem:[#allocation5 + $0x40] sm:$0xff]  ;;  %v773_v23 = vld [vmem:[#allocation5 + $0x50] sm:$0xff]  ;;  %v1303_v24 = vpack.c.bf16 %v837_v21, %v835_v19  ;;  %v794_v19 = vld [vmem:[#allocation5 + $0xf8] sm:$0xff] }
 0x101   : > { %v291_v26 = vpop.xlane.xlu1 %290  ;;  %v288_v27 = vpop.xlane.xlu0 %287  ;;  %1290 = vmatprep.subr.bf16.mxu1 %v1691_v16 }
 0x102   : > { %v295_v28 = vmul.f32 0.00390625, %v291_v26  ;;  %v294_v29 = vmul.f32 0.00390625, %v288_v27  ;;  %1283 = vmatpush3.bf16.msra.mxu0 %v1282_v25  ;;  %v840_v25 = vld [vmem:[#allocation7 + $0x68] sm:$0xff]  ;;  %v842_v26 = vld [vmem:[#allocation7 + $0x78] sm:$0xff] }
 0x103   : > { %1284 = vmatprep.subr.bf16.mxu0 %v1691_v16  ;;  %v1301_v16 = vpack.c.bf16 %v838_v14, %v836_v13  ;;  %v776_v27 = vld [vmem:[#allocation5 + $0x68] sm:$0xff]  ;;  %v787_v13 = vld [vmem:[#allocation5 + $0xc0] sm:$0xff] }
 0x104   : > { %v1285_v30 = vpack.c.bf16 %v295_v28, %v294_v29  ;;  %v1367_v28 = vpack.c.bf16 %v773_v23, %v771_v22  ;;  %v1305_v29 = vpack.c.bf16 %v842_v26, %v840_v25  ;;  %v855_v23 = vld [vmem:[#allocation7 + $0xe0] sm:$0xff]  ;;  %v1385_v26 = vpack.c.bf16 %v794_v19, %v792_v18 }
 0x105   : > { %v307_v31 = vpop.xlane.xlu1 %306  ;;  %v304_v32 = vpop.xlane.xlu0 %303  ;;  %v791_v25 = vld [vmem:[#allocation5 + $0xe0] sm:$0xff] }
 0x106   : > { %v1291_v33 = vpack.c.bf16 %v307_v31, %v304_v32  ;;  %1286 = vmatpush3.bf16.msra.mxu0 %v1285_v30  ;;  %v778_v30 = vld [vmem:[#allocation5 + $0x78] sm:$0xff]  ;;  %v839_v31 = vld [vmem:[#allocation7 + $0x60] sm:$0xff]  ;;  %v841_v32 = vld [vmem:[#allocation7 + $0x70] sm:$0xff] }
 0x108   : > { %1292 = vmatpush3.bf16.msra.mxu1 %v1291_v33  ;;  %v1369_v33 = vpack.c.bf16 %v778_v30, %v776_v27  ;;  %v793_v27 = vld [vmem:[#allocation5 + $0xf0] sm:$0xff]  ;;  %v796_v30 = vld [vmem:[#allocation5 + $0x108] sm:$0xff] }
 0x109   : > { %1252 = vmatmul.mubr.msk.f32.vlgmr.msra.gmra.mrb[0].mxu0 %vm309_vm1, %v308_v34 }
 0x10a   : > { %1275 = vmatprep.mubr.msk.f32.mxu0 %vm459_vm2, %v384_v35 }
 0x10b   : > { %1263 = vmatmul.mubr.msk.f32.vlgmr.msra.gmra.mrb[0].mxu1 %vm309_vm1, %v308_v34  ;;  %v775_v34 = vld [vmem:[#allocation5 + $0x60] sm:$0xff] }
 0x10c   : > { %1267 = vmatprep.mubr.msk.f32.mxu1 %vm459_vm2, %v384_v35  ;;  %v777_v35 = vld [vmem:[#allocation5 + $0x70] sm:$0xff] }
 0x1dc   : > { %v379_v36 = vpop.f32.mrb[0].mxu0 }
 0x1dd   : > { %v383_v37 = vmax.f32 %v379_v36, 0.0  ;;  %v1253_v38 = vpop.f32.mrb[1].mxu0  ;;  %v844_v36 = vld [vmem:[#allocation7 + $0x88] sm:$0xff] }
 0x1de   : > { %v454_v39 = vpop.f32.mrb[0].mxu1  ;;  %v780_v38 = vld [vmem:[#allocation5 + $0x88] sm:$0xff] }
 0x1df   : > { %v458_v41 = vmax.f32 %v454_v39, 0.0  ;;  %v1264_v42 = vpop.f32.mrb[1].mxu1  ;;  %1273 = vmatprep.subr.msk.mxu0 %vm472_vm3, %v383_v37  ;;  %v782_v39 = vld [vmem:[#allocation5 + $0x98] sm:$0xff] }
 0x1e0   : > { %1274 = vmatpush3.msk.msra.mxu0 %vm472_vm3, %v383_v37  ;;  %v846_v37 = vld [vmem:[#allocation7 + $0x98] sm:$0xff]  ;;  %v1373_v46 = vpack.c.bf16 %v782_v39, %v780_v38  ;;  %v795_v38 = vld [vmem:[#allocation5 + $0x100] sm:$0xff]  ;;  %v797_v39 = vld [vmem:[#allocation5 + $0x110] sm:$0xff] }
 0x1e1   : > { %1265 = vmatprep.subr.msk.mxu1 %vm472_vm3, %v458_v41  ;;  %1276 = vmatmul.mubr.msk.f32.vlgmr.msra.gmra.mrb[2].mxu0 %vm459_vm2, %v385_v40  ;;  %v1309_v42 = vpack.c.bf16 %v846_v37, %v844_v36  ;;  %v861_v36 = vld [vmem:[#allocation7 + $0x110] sm:$0xff] }
 0x1e2   : > { %1266 = vmatpush3.msk.msra.mxu1 %vm472_vm3, %v458_v41  ;;  %1278 = vmatprep.mubr.msk.f32.mxu0 %vm459_vm2, %v386_v43  ;;  %v1371_v41 = vpack.c.bf16 %v777_v35, %v775_v34  ;;  %v859_v35 = vld [vmem:[#allocation7 + $0x100] sm:$0xff] }
 0x1e3   : > { %1268 = vmatmul.mubr.msk.f32.vlgmr.msra.gmra.mrb[2].mxu1 %vm459_vm2, %v385_v40  ;;  %1294 = vmatprep.subr.bf16.mxu0 %v1293_v49  ;;  %v1307_v40 = vpack.c.bf16 %v841_v32, %v839_v31  ;;  %v850_v49 = vld [vmem:[#allocation7 + $0xb8] sm:$0xff] }
 0x1e4   : > { %1270 = vmatprep.mubr.msk.f32.mxu1 %vm459_vm2, %v386_v43  ;;  %1358 = vmatprep.subr.bf16.mxu1 %v1357_v53  ;;  %v843_v43 = vld [vmem:[#allocation7 + $0x80] sm:$0xff]  ;;  %v1375_v53 = vpack.c.bf16 %v781_v47, %v779_v45  ;;  %v798_v31 = vld [vmem:[#allocation5 + $0x118] sm:$0xff] }
 0x1e5   : > { %1279 = vmatmul.mubr.msk.f32.gmra.mrb[4].mxu0 %vm459_vm2, %v387_v44  ;;  %1360 = vmatpush1.bf16.msra.mxu1 %v1359_v58  ;;  %v1377_v58 = vpack.c.bf16 %v786_v51, %v784_v50  ;;  %v1389_v37 = vpack.c.bf16 %v798_v31, %v796_v30 }
 0x1e6   : > { %1296 = vmatpush1.bf16.msra.mxu0 %v1295_v54  ;;  %1362 = vmatprep.subr.bf16.mxu1 %v1361_v63  ;;  %v1313_v54 = vpack.c.bf16 %v850_v49, %v848_v48  ;;  %v790_v63 = vld [vmem:[#allocation5 + $0xd8] sm:$0xff] }
 0x1e7   : > { %1271 = vmatmul.mubr.msk.f32.gmra.mrb[4].mxu1 %vm459_vm2, %v387_v44  ;;  %1298 = vmatprep.subr.bf16.mxu0 %v1297_v62  ;;  %v845_v44 = vld [vmem:[#allocation7 + $0x90] sm:$0xff]  ;;  %v788_v62 = vld [vmem:[#allocation5 + $0xc8] sm:$0xff] }
 0x1e8   : > { %v1311_v52 = vpack.c.bf16 %v845_v44, %v843_v43  ;;  %v1381_v14 = vpack.c.bf16 %v790_v63, %v788_v62 }
 0x1e9   : > { %1364 = vmatpush1.bf16.msra.mxu1 %v1363_v15  ;;  %v789_v15 = vld [vmem:[#allocation5 + $0xd0] sm:$0xff] }
 0x1ea   : > { %1300 = vmatpush1.bf16.msra.mxu0 %v1299_v7  ;;  %1366 = vmatprep.subr.bf16.mxu1 %v1365_v20  ;;  %v851_v7 = vld [vmem:[#allocation7 + $0xc0] sm:$0xff]  ;;  %v1383_v21 = vpack.c.bf16 %v789_v15, %v787_v13 }
 0x1eb   : > { %1302 = vmatprep.subr.bf16.mxu0 %v1301_v16  ;;  %v856_v16 = vld [vmem:[#allocation7 + $0xe8] sm:$0xff]  ;;  %v1319_v20 = vpack.c.bf16 %v853_v12, %v851_v7 }
 0x1ec   : > { %v1321_v22 = vpack.c.bf16 %v858_v17, %v856_v16 }
 0x1ed   : > { %1368 = vmatpush1.bf16.msra.mxu1 %v1367_v28  ;;  %v860_v28 = vld [vmem:[#allocation7 + $0x108] sm:$0xff] }
 0x1ee   : > { %1304 = vmatpush1.bf16.msra.mxu0 %v1303_v24  ;;  %1370 = vmatprep.subr.bf16.mxu1 %v1369_v33  ;;  %v857_v24 = vld [vmem:[#allocation7 + $0xf0] sm:$0xff]  ;;  %v1387_v33 = vpack.c.bf16 %v793_v27, %v791_v25  ;;  %v863_v27 = vld [vmem:[#allocation7 + $0x120] sm:$0xff] }
 0x1ef   : > { %1306 = vmatprep.subr.bf16.mxu0 %v1305_v29  ;;  %v862_v29 = vld [vmem:[#allocation7 + $0x118] sm:$0xff]  ;;  %v1323_v32 = vpack.c.bf16 %v857_v24, %v855_v23  ;;  %v800_v23 = vld [vmem:[#allocation5 + $0x128] sm:$0xff] }
 0x1f0   : > { %v1325_v34 = vpack.c.bf16 %v862_v29, %v860_v28  ;;  %v865_v28 = vld [vmem:[#allocation7 + $0x130] sm:$0xff] }
 0x1f1   : > { %1372 = vmatpush1.bf16.msra.mxu1 %v1371_v41  ;;  %v1391_v41 = vpack.c.bf16 %v797_v39, %v795_v38  ;;  %v1331_v31 = vpack.c.bf16 %v865_v28, %v863_v27  ;;  %v868_v38 = vld [vmem:[#allocation7 + $0x148] sm:$0xff]  ;;  %v870_v39 = vld [vmem:[#allocation7 + $0x158] sm:$0xff]  ;;  %v879_v27 = vld [vmem:[#allocation7 + $0x1a0] sm:$0xff] }
 0x1f2   : > { %1308 = vmatpush1.bf16.msra.mxu0 %v1307_v40  ;;  %1374 = vmatprep.subr.bf16.mxu1 %v1373_v46  ;;  %v1327_v40 = vpack.c.bf16 %v861_v36, %v859_v35  ;;  %v881_v28 = vld [vmem:[#allocation7 + $0x1b0] sm:$0xff] }
 0x1f3   : > { %1310 = vmatprep.subr.bf16.mxu0 %v1309_v42 }
 0x1f5   : > { %1376 = vmatpush1.bf16.msra.mxu1 %v1375_v53 }
 0x1f6   : > { %1312 = vmatpush1.bf16.msra.mxu0 %v1311_v52  ;;  %1378 = vmatprep.subr.bf16.mxu1 %v1377_v58 }
 0x1f7   : > { %1314 = vmatprep.subr.bf16.mxu0 %v1313_v54 }
 0x1f9   : > { %1380 = vmatpush1.bf16.msra.mxu1 %v1379_v4 }
 0x1fa   : > { %1316 = vmatpush1.bf16.msra.mxu0 %v1315_v3  ;;  %1382 = vmatprep.subr.bf16.mxu1 %v1381_v14 }
 0x1fb   : > { %1318 = vmatprep.subr.bf16.mxu0 %v1317_v6 }
 0x1fd   : > { %1384 = vmatpush1.bf16.msra.mxu1 %v1383_v21  ;;  %v864_v21 = vld [vmem:[#allocation7 + $0x128] sm:$0xff] }
 0x1fe   : > { %1320 = vmatpush1.bf16.msra.mxu0 %v1319_v20  ;;  %1386 = vmatprep.subr.bf16.mxu1 %v1385_v26  ;;  %v802_v26 = vld [vmem:[#allocation5 + $0x138] sm:$0xff] }
 0x1ff   : > { %1322 = vmatprep.subr.bf16.mxu0 %v1321_v22  ;;  %v866_v22 = vld [vmem:[#allocation7 + $0x138] sm:$0xff]  ;;  %v1393_v30 = vpack.c.bf16 %v802_v26, %v800_v23 }
 0x200   : > { %v1329_v25 = vpack.c.bf16 %v866_v22, %v864_v21  ;;  %v880_v22 = vld [vmem:[#allocation7 + $0x1a8] sm:$0xff]  ;;  %v882_v23 = vld [vmem:[#allocation7 + $0x1b8] sm:$0xff] }
 0x201   : > { %1388 = vmatpush1.bf16.msra.mxu1 %v1387_v33  ;;  %v801_v33 = vld [vmem:[#allocation5 + $0x130] sm:$0xff]  ;;  %v818_v26 = vld [vmem:[#allocation5 + $0x1b8] sm:$0xff] }
 0x202   : > { %1324 = vmatpush1.bf16.msra.mxu0 %v1323_v32  ;;  %1390 = vmatprep.subr.bf16.mxu1 %v1389_v37  ;;  %v799_v32 = vld [vmem:[#allocation5 + $0x120] sm:$0xff] }
 0x203   : > { %1326 = vmatprep.subr.bf16.mxu0 %v1325_v34  ;;  %v1395_v36 = vpack.c.bf16 %v801_v33, %v799_v32  ;;  %v817_v32 = vld [vmem:[#allocation5 + $0x1b0] sm:$0xff] }
 0x205   : > { %1392 = vmatpush1.bf16.msra.mxu1 %v1391_v41 }
 0x206   : > { %1328 = vmatpush1.bf16.msra.mxu0 %v1327_v40  ;;  %1394 = vmatprep.subr.bf16.mxu1 %v1393_v30  ;;  %v804_v40 = vld [vmem:[#allocation5 + $0x148] sm:$0xff]  ;;  %v1347_v30 = vpack.c.bf16 %v881_v28, %v879_v27 }
 0x207   : > { %1330 = vmatprep.subr.bf16.mxu0 %v1329_v25  ;;  %v1345_v25 = vpack.c.bf16 %v882_v23, %v880_v22 }
 0x209   : > { %1396 = vmatpush1.bf16.msra.mxu1 %v1395_v36  ;;  %v820_v36 = vld [vmem:[#allocation5 + $0x1c8] sm:$0xff] }
 0x20a   : > { %1332 = vmatpush1.bf16.msra.mxu0 %v1331_v31  ;;  %v815_v31 = vld [vmem:[#allocation5 + $0x1a0] sm:$0xff] }
 0x20b   : > { %v1411_v33 = vpack.c.bf16 %v817_v32, %v815_v31 }
 0x2b4   : > { %v1277_v42 = vpop.f32.mrb[2].mxu0 }
 0x2b5   : > { %v630_v43 = vpop.f32.mrb[3].mxu0 }
 0x2b6   : > { %v1269_v44 = vpop.f32.mrb[2].mxu1 }
 0x2b7   : > { %v636_v45 = vadd.f32 %v1277_v42, %v1269_v44  ;;  %v542_v46 = vpop.f32.mrb[3].mxu1  ;;  %v1333_v42 = vpack.c.bf16 %v870_v39, %v868_v38  ;;  %v867_v44 = vld [vmem:[#allocation7 + $0x140] sm:$0xff]  ;;  %v822_v38 = vld [vmem:[#allocation5 + $0x1d8] sm:$0xff] }
 0x2b8   : > { %v631_v47 = vadd.f32 %v630_v43, %v542_v46  ;;  %v1280_v48 = vpop.f32.mrb[4].mxu0  ;;  %v806_v43 = vld [vmem:[#allocation5 + $0x158] sm:$0xff]  ;;  %v883_v39 = vld [vmem:[#allocation7 + $0x1c0] sm:$0xff] }
 0x2b9   : > { %v650_v49 = vand.u32 2147483647, %v636_v45  ;;  %v640_v50 = vpop.f32.mrb[5].mxu0  ;;  %vm666_vm4 = vcmp.ge.f32.partialorder %v636_v45, 0.0  ;;  %v869_v45 = vld [vmem:[#allocation7 + $0x150] sm:$0xff]  ;;  %v1397_v46 = vpack.c.bf16 %v806_v43, %v804_v40  ;;  %1334 = vmatprep.subr.bf16.mxu0 %v1333_v42  ;;  %v819_v43 = vld [vmem:[#allocation5 + $0x1c0] sm:$0xff] }
 0x2ba   : > { %v649_v51 = vand.u32 2147483647, %v631_v47  ;;  %v1272_v52 = vpop.f32.mrb[4].mxu1  ;;  %vm665_vm5 = vcmp.ge.f32.partialorder %v631_v47, 0.0  ;;  %v1335_v47 = vpack.c.bf16 %v869_v45, %v867_v44  ;;  %v885_v40 = vld [vmem:[#allocation7 + $0x1d0] sm:$0xff] }
 0x2bb   : > { %v654_v53 = vsub.f32 0.0, %v650_v49  ;;  %v1978_v54 = vadd.f32 %v1280_v48, %v1272_v52  ;;  %v552_v55 = vpop.f32.mrb[5].mxu1  ;;  %v803_v48 = vld [vmem:[#allocation5 + $0x140] sm:$0xff]  ;;  %v805_v49 = vld [vmem:[#allocation5 + $0x150] sm:$0xff]  ;;  %1398 = vmatprep.subr.bf16.mxu1 %v1397_v46  ;;  %v1351_v42 = vpack.c.bf16 %v885_v40, %v883_v39  ;;  %v888_v46 = vld [vmem:[#allocation7 + $0x1e8] sm:$0xff] }
 0x2bc   : > { %v653_v56 = vsub.f32 0.0, %v649_v51  ;;  %v1980_v57 = vadd.f32 %v640_v50, %v552_v55  ;;  %v1399_v52 = vpack.c.bf16 %v805_v49, %v803_v48  ;;  %v874_v55 = vld [vmem:[#allocation7 + $0x178] sm:$0xff]  ;;  %1336 = vmatpush1.bf16.msra.mxu0 %v1335_v47  ;;  %v821_v44 = vld [vmem:[#allocation5 + $0x1d0] sm:$0xff]  ;;  %v824_v48 = vld [vmem:[#allocation5 + $0x1e8] sm:$0xff] }
 0x2bd   : > { %v659_v58 = vmul.f32 1.442695, %v654_v53  ;;  %v652_v59 = vand.u32 2147483647, %v1978_v54  ;;  %v872_v53 = vld [vmem:[#allocation7 + $0x168] sm:$0xff]  ;;  %vm668_vm7 = vcmp.ge.f32.partialorder %v1978_v54, 0.0  ;;  %v1415_v45 = vpack.c.bf16 %v821_v44, %v819_v43 }
 0x2be   : > { %v657_v60 = vmul.f32 1.442695, %v653_v56  ;;  %v651_v61 = vand.u32 2147483647, %v1980_v57  ;;  %vm667_vm6 = vcmp.ge.f32.partialorder %v1980_v57, 0.0  ;;  %v808_v56 = vld [vmem:[#allocation5 + $0x168] sm:$0xff]  ;;  %1400 = vmatpush1.bf16.msra.mxu1 %v1399_v52 }
 0x2bf   : > { %1504 = vpow2.f32 %v659_v58  ;;  %v656_v62 = vsub.f32 0.0, %v652_v59  ;;  %v1337_v58 = vpack.c.bf16 %v874_v55, %v872_v53  ;;  %v810_v59 = vld [vmem:[#allocation5 + $0x178] sm:$0xff]  ;;  %v889_v52 = vld [vmem:[#allocation7 + $0x1f0] sm:$0xff] }
 0x2c0   : > { %1506 = vpow2.f32 %v657_v60  ;;  %v655_v63 = vsub.f32 0.0, %v651_v61  ;;  %v871_v60 = vld [vmem:[#allocation7 + $0x160] sm:$0xff]  ;;  %v873_v61 = vld [vmem:[#allocation7 + $0x170] sm:$0xff]  ;;  %v1401_v57 = vpack.c.bf16 %v810_v59, %v808_v56  ;;  %v890_v47 = vld [vmem:[#allocation7 + $0x1f8] sm:$0xff] }
 0x2c1   : > { %v663_v3 = vmul.f32 1.442695, %v656_v62  ;;  %v1339_v62 = vpack.c.bf16 %v873_v61, %v871_v60  ;;  %1338 = vmatprep.subr.bf16.mxu0 %v1337_v58  ;;  %v1353_v49 = vpack.c.bf16 %v890_v47, %v888_v46  ;;  %v823_v56 = vld [vmem:[#allocation5 + $0x1e0] sm:$0xff]  ;;  %v825_v58 = vld [vmem:[#allocation5 + $0x1f0] sm:$0xff] }
 0x2c2   : > { %v661_v4 = vmul.f32 1.442695, %v655_v63  ;;  %v807_v63 = vld [vmem:[#allocation5 + $0x160] sm:$0xff]  ;;  %1402 = vmatprep.subr.bf16.mxu1 %v1401_v57  ;;  %v1419_v59 = vpack.c.bf16 %v825_v58, %v823_v56 }
 0x2c3   : > { %1508 = vpow2.f32 %v663_v3  ;;  %v809_v3 = vld [vmem:[#allocation5 + $0x170] sm:$0xff]  ;;  %1340 = vmatpush1.bf16.msra.mxu0 %v1339_v62 }
 0x2c4   : > { %1510 = vpow2.f32 %v661_v4 }
 0x2c9   : > { %v1505_v6 = vpop.eup %1504 }
 0x2ca   : > { %v1507_v7 = vpop.eup %1506  ;;  %v670_v12 = vadd.f32 1.0, %v1505_v6 }
 0x2cb   : > { %v669_v13 = vadd.f32 1.0, %v1507_v7 }
 0x2cc   : > { %1512 = vrcp.f32 %v670_v12  ;;  %v878_v12 = vld [vmem:[#allocation7 + $0x198] sm:$0xff] }
 0x2cd   : > { %v1509_v14 = vpop.eup %1508  ;;  %1514 = vrcp.f32 %v669_v13  ;;  %v812_v13 = vld [vmem:[#allocation5 + $0x188] sm:$0xff] }
 0x2ce   : > { %v1511_v15 = vpop.eup %1510  ;;  %v672_v16 = vadd.f32 1.0, %v1509_v14 }
 0x2cf   : > { %v671_v17 = vadd.f32 1.0, %v1511_v15 }
 0x2d0   : > { %1516 = vrcp.f32 %v672_v16  ;;  %v875_v16 = vld [vmem:[#allocation7 + $0x180] sm:$0xff] }
 0x2d1   : > { %1518 = vrcp.f32 %v671_v17  ;;  %v877_v17 = vld [vmem:[#allocation7 + $0x190] sm:$0xff] }
 0x2d2   : > { %v1343_v54 = vpack.c.bf16 %v877_v17, %v875_v16 }
 0x2d6   : > { %v1513_v18 = vpop.eup %1512 }
 0x2d7   : > { %v1515_v19 = vpop.eup %1514  ;;  %v682_v20 = vmul.f32 %v1513_v18, %v1505_v6  ;;  %v1403_v6 = vpack.c.bf16 %v809_v3, %v807_v63 }
 0x2d8   : > { %v681_v24 = vmul.f32 %v1515_v19, %v1507_v7  ;;  %v876_v7 = vld [vmem:[#allocation7 + $0x188] sm:$0xff] }
 0x2d9   : > { %v686_v29 = vsel %vm666_vm4, %v1513_v18, %v682_v20  ;;  %1404 = vmatpush1.bf16.msra.mxu1 %v1403_v6  ;;  %v813_v20 = vld [vmem:[#allocation5 + $0x190] sm:$0xff] }
 0x2da   : > { %v1517_v34 = vpop.eup %1516  ;;  %696 = vperm.xlu1 %1503, %v686_v29   ;;  %v685_v35 = vsel %vm665_vm5, %v1515_v19, %v681_v24  ;;  %v811_v19 = vld [vmem:[#allocation5 + $0x180] sm:$0xff]  ;;  %v816_v24 = vld [vmem:[#allocation5 + $0x1a8] sm:$0xff] }
 0x2db   : > { %v1519_v37 = vpop.eup %1518  ;;  %691 = vperm.xlu0 %1502, %v685_v35   ;;  %v684_v51 = vmul.f32 %v1517_v34, %v1509_v14  ;;  %v1341_v14 = vpack.c.bf16 %v878_v12, %v876_v7  ;;  %v1407_v21 = vpack.c.bf16 %v813_v20, %v811_v19  ;;  %v1409_v29 = vpack.c.bf16 %v818_v26, %v816_v24  ;;  %v886_v35 = vld [vmem:[#allocation7 + $0x1d8] sm:$0xff] }
 0x2dc   : > { %v683_v41 = vmul.f32 %v1519_v37, %v1511_v15  ;;  %v814_v15 = vld [vmem:[#allocation5 + $0x198] sm:$0xff] }
 0x2dd   : > { %v688_v4 = vsel %vm668_vm7, %v1517_v34, %v684_v51  ;;  %v1405_v18 = vpack.c.bf16 %v814_v15, %v812_v13  ;;  %1342 = vmatprep.subr.bf16.mxu0 %v1341_v14  ;;  %v884_v34 = vld [vmem:[#allocation7 + $0x1c8] sm:$0xff]  ;;  %v887_v51 = vld [vmem:[#allocation7 + $0x1e0] sm:$0xff] }
 0x2de   : > { %v687_v50 = vsel %vm667_vm6, %v1519_v37, %v683_v41  ;;  %1344 = vmatpush1.bf16.msra.mxu0 %v1343_v54  ;;  %v1349_v37 = vpack.c.bf16 %v886_v35, %v884_v34  ;;  %v1413_v41 = vpack.c.bf16 %v822_v38, %v820_v36  ;;  %v1355_v55 = vpack.c.bf16 %v889_v52, %v887_v51 }
 0x2df   : > { %701 = vperm.xlu1 %1503, %v687_v50   ;;  %1406 = vmatprep.subr.bf16.mxu1 %v1405_v18  ;;  %v826_v50 = vld [vmem:[#allocation5 + $0x1f8] sm:$0xff] }
 0x2e0   : > { %1408 = vmatpush1.bf16.msra.mxu1 %v1407_v21  ;;  %1346 = vmatprep.subr.bf16.mxu0 %v1345_v25  ;;  %v1417_v53 = vpack.c.bf16 %v826_v50, %v824_v48 }
 0x2e1   : > { %1410 = vmatprep.subr.bf16.mxu1 %v1409_v29 }
 0x2e2   : > { %1348 = vmatpush1.bf16.msra.mxu0 %v1347_v30 }
 0x2e3   : > { %706 = vperm.xlu1 %1503, %v688_v4   ;;  %1350 = vmatprep.subr.bf16.mxu0 %v1349_v37 }
 0x2e4   : > { %1412 = vmatpush1.bf16.msra.mxu1 %v1411_v33 }
 0x2e5   : > { %1414 = vmatprep.subr.bf16.mxu1 %v1413_v41 }
 0x2e6   : > { %1352 = vmatpush1.bf16.msra.mxu0 %v1351_v42 }
 0x2e7   : > { %1354 = vmatprep.subr.bf16.mxu0 %v1353_v49 }
 0x2e8   : > { %1416 = vmatpush1.bf16.msra.mxu1 %v1415_v45 }
 0x2e9   : > { %1418 = vmatprep.subr.bf16.mxu1 %v1417_v53 }
 0x2ea   : > { %1356 = vmatpush1.bf16.msra.mxu0 %v1355_v55 }
 0x2ec   : > { %1420 = vmatpush1.bf16.msra.mxu1 %v1419_v59 }
 0x359   : > { %v697_v60 = vpop.permute.xlu1 %696 }
 0x35a   : > { %v692_v61 = vpop.permute.xlu0 %691  ;;  %v1987_v57 = vmul.f32 %v697_v60, %v1927_v2  ;;  %v1990_v62 = vmul.f32 %v697_v60, %v1933_v5 }
 0x35b   : > { %v1993_v63 = vmul.f32 %v692_v61, %v1923_v0  ;;  %v1996_v3 = vmul.f32 %v692_v61, %v1925_v1 }
 0x35d   : > { %v725_v2 = vadd.f32 %v1987_v57, %v1993_v63  ;;  %v734_v5 = vadd.f32 %v1990_v62, %v1996_v3 }
 0x35e   : > { %v702_v4 = vpop.permute.xlu1 %701 }
 0x35f   : > { %v1999_v6 = vmul.f32 %v702_v4, %v1943_v10  ;;  %v2002_v7 = vmul.f32 %v702_v4, %v1945_v11  ;;  %v1061_v4 = vlaneseq }
 0x361   : > { %v726_v0 = vadd.f32 %v725_v2, %v1999_v6  ;;  %v735_v13 = vadd.f32 %v734_v5, %v2002_v7  ;;  %v745_v11 = vmax.f32 %v1993_v63, %v1999_v6  ;;  %v754_v14 = vmax.f32 %v1996_v3, %v2002_v7 }
 0x362   : > { %v707_v12 = vpop.permute.xlu1 %706  ;;  %v1062_v2 = vshrl.u32 %v1061_v4, 7 }
 0x363   : > { %v2011_v1 = vmul.f32 %v707_v12, %v1939_v8  ;;  %v2014_v10 = vmul.f32 %v707_v12, %v1941_v9 }
 0x364   : > { %v1063_v12 = vsub.s32 0, %v1062_v2 }
 0x365   : > { %v727_v15 = vadd.f32 %v726_v0, %v2011_v1  ;;  %v736_v16 = vadd.f32 %v735_v13, %v2014_v10  ;;  %v746_v17 = vmax.f32 %v1987_v57, %v2011_v1  ;;  %v755_v8 = vmax.f32 %v1990_v62, %v2014_v10 }
 0x367   : > { %v728_v18 = vrot.slane %v727_v15, 4  ;;  %v737_v54 = vrot.slane %v736_v16, 4  ;;  %v747_v9 = vmax.f32 %v745_v11, %v746_v17  ;;  %v756_v19 = vmax.f32 %v754_v14, %v755_v8 }
 0x369   : > { %v729_v20 = vadd.f32 %v728_v18, %v727_v15  ;;  %v738_v21 = vadd.f32 %v737_v54, %v736_v16  ;;  %v748_v22 = vrot.slane %v747_v9, 4  ;;  %v757_v23 = vrot.slane %v756_v19, 4 }
 0x36b   : > { %v730_v24 = vrot.slane %v729_v20, 2  ;;  %v749_v25 = vmax.f32 %v747_v9, %v748_v22  ;;  %v758_v26 = vmax.f32 %v756_v19, %v757_v23  ;;  %v739_v27 = vrot.slane %v738_v21, 2 }
 0x36d   : > { %v731_v28 = vadd.f32 %v730_v24, %v729_v20  ;;  %v750_v29 = vrot.slane %v749_v25, 2  ;;  %v759_v30 = vrot.slane %v758_v26, 2  ;;  %v740_v31 = vadd.f32 %v739_v27, %v738_v21 }
 0x36f   : > { %v732_v32 = vrot.slane %v731_v28, 1  ;;  %v751_v33 = vmax.f32 %v749_v25, %v750_v29  ;;  %v760_v34 = vmax.f32 %v758_v26, %v759_v30  ;;  %v741_v35 = vrot.slane %v740_v31, 1 }
 0x371   : > { %v733_v36 = vadd.f32 %v732_v32, %v731_v28  ;;  %v752_v37 = vrot.slane %v751_v33, 1  ;;  %v761_v38 = vrot.slane %v760_v34, 1  ;;  %v742_v39 = vadd.f32 %v741_v35, %v740_v31 }
 0x373   : > { %v743_v40 = vmul.f32 0.03125, %v733_v36  ;;  %v762_v41 = vmax.f32 %v760_v34, %v761_v38  ;;  %v744_v42 = vmul.f32 0.03125, %v742_v39  ;;  %v753_v43 = vmax.f32 %v751_v33, %v752_v37 }
 0x375   : > { %955 = vmatprep.mubr.f32.mxu0 %v762_v41  ;;  %1026 = vmatprep.mubr.f32.mxu1 %v744_v42 }
 0x376   : > { %956 = vmatmul.mubr.f32.vlgmr.msra.gmra.mrb[6].mxu0 %v753_v43  ;;  %1027 = vmatmul.mubr.f32.vlgmr.msra.gmra.mrb[6].mxu1 %v743_v40 }
 0x449   : > { %v957_v44 = vpop.f32.mrb[6].mxu0  ;;  %v1028_v45 = vpop.f32.mrb[6].mxu1 }
 0x44a   : > { %v1029_v46 = vadd.f32 %v1028_v45, %v957_v44  ;;  %v959_v47 = vpop.f32.mrb[7].mxu0  ;;  %v1030_v48 = vpop.f32.mrb[7].mxu1 }
 0x44b   : > { %v1031_v49 = vadd.f32 %v1030_v48, %v959_v47 }
 0x44c   : > { %v1033_v50 = vand.u32 2147483647, %v1029_v46  ;;  %vm1041_vm8 = vcmp.ge.f32.partialorder %v1029_v46, 0.0 }
 0x44d   : > { %v1034_v51 = vand.u32 2147483647, %v1031_v49  ;;  %vm1042_vm9 = vcmp.ge.f32.partialorder %v1031_v49, 0.0 }
 0x44e   : > { %v1035_v52 = vsub.f32 0.0, %v1033_v50 }
 0x44f   : > { %v1036_v53 = vsub.f32 0.0, %v1034_v51 }
 0x450   : > { %v1037_v55 = vmul.f32 1.442695, %v1035_v52 }
 0x451   : > { %v1039_v56 = vmul.f32 1.442695, %v1036_v53 }
 0x452   : > { %1520 = vpow2.f32 %v1037_v55 }
 0x453   : > { %1522 = vpow2.f32 %v1039_v56 }
 0x45c   : > { %v1521_v58 = vpop.eup %1520 }
 0x45d   : > { %v1523_v59 = vpop.eup %1522  ;;  %v1043_v60 = vadd.f32 1.0, %v1521_v58 }
 0x45e   : > { %v1044_v61 = vadd.f32 1.0, %v1523_v59 }
 0x45f   : > { %1524 = vrcp.f32 %v1043_v60 }
 0x460   : > { %1526 = vrcp.f32 %v1044_v61 }
 0x469   : > { %v1525_v5 = vpop.eup %1524 }
 0x46a   : > { %v1527_v0 = vpop.eup %1526  ;;  %v1049_v13 = vmul.f32 %v1525_v5, %v1521_v58 }
 0x46b   : > { %v1050_v11 = vmul.f32 %v1527_v0, %v1523_v59 }
 0x46c   : > { %v1051_v14 = vsel %vm1041_vm8, %v1525_v5, %v1049_v13 }
 0x46d   : > { %v1064_v15 = vrot.slane %v1051_v14, %v1063_v12  ;;  %v1052_v16 = vsel %vm1042_vm9, %v1527_v0, %v1050_v11 }
 0x46e   : > { %v1068_v17 = vrot.slane %v1052_v16, %v1063_v12 }
 0x46f   : > { %v1069_v8 = vmul.f32 %v1064_v15, %v1993_v63  ;;  %v1071_v18 = vmul.f32 %v1064_v15, %v1987_v57  ;;  %v1073_v54 = vmul.f32 %v1064_v15, %v1999_v6  ;;  %v1075_v9 = vmul.f32 %v1064_v15, %v2011_v1 }
 0x470   : > { %v1070_v19 = vmul.f32 %v1068_v17, %v1996_v3  ;;  %v1072_v63 = vmul.f32 %v1068_v17, %v1990_v62  ;;  %v1074_v57 = vmul.f32 %v1068_v17, %v2002_v7  ;;  %v1076_v6 = vmul.f32 %v1068_v17, %v2014_v10 }
 0x471   : > { %1077 = vst [vmem:[%s271_s7] sm:$0xff] %v1069_v8  ;;  %1079 = vst [vmem:[%s271_s7 + $0x10] sm:$0xff] %v1071_v18 }
 0x472   : > { %1081 = vst [vmem:[%s271_s7 + $0x20] sm:$0xff] %v1073_v54  ;;  %1083 = vst [vmem:[%s271_s7 + $0x30] sm:$0xff] %v1075_v9 }
 0x473   : > { %1078 = vst [vmem:[%s271_s7 + $0x8] sm:$0xff] %v1070_v19  ;;  %1080 = vst [vmem:[%s271_s7 + $0x18] sm:$0xff] %v1072_v63 }
 0x474   : > { %1082 = vst [vmem:[%s271_s7 + $0x28] sm:$0xff] %v1074_v57  ;;  %1084 = vst [vmem:[%s271_s7 + $0x38] sm:$0xff] %v1076_v6 }
 0x475   : > { %1627 = shalt.err (!%p1624_p1)
}
 0x476   : > { %s1628_s28 = scalar_lea.hbm %s2036_s26, 1024  ;;  %s1632_s30 = scalar_lea.hbm %s2091_s5, 2048 }
 0x477   : > { %p1629_p13 = scmp.ne.s32.totalorder %s2036_s26, %s1628_s28  ;;  %p1633_p4 = scmp.lt.u32.totalorder %s2036_s26, %s2091_s5 }
 0x478   : > { %p1634_p5 = scmp.lt.u32.totalorder %s1632_s30, %s1628_s28  ;;  %p1636_p11 = scmp.lt.u32.totalorder %s1628_s28, %s2036_s26 }
 0x479   : > { %p1630_p6 = pnand %p1629_p13, %p2105_p0 }
 0x47a   : > { %p1635_p8 = por %p1634_p5, %p1633_p4 }
 0x47b   : > { %p1631_p10 = pneg %p1630_p6 }
 0x47c   : > { %p1637_p2 = por %p1636_p11, %p1635_p8 }
 0x47e   : > { %p1638_p3 = pnand %p1637_p2, %p1631_p10 }
 0x480   : > { %1641 = shalt.err (!%p1638_p3)
}
 0x481   : > { %s1696_s7 = smov 256   ;;  %s1697_s12 = smov 16  }
 0x482   : > { %1437 = dma.vmem_to_hbm [thread:$0]  (%p2105_p0), %s2038_s8, 1024, %s2036_s26, %s1086_s22, %s1696_s7, %s1696_s7, %s1697_s12  }
 0x483 PF: > { %s1114_s24 = sand.u32 1, %s1672_s18   ;;  %p2106_p7 = scmp.ne.s32.totalorder %s2096_s25, 0 }
 0x484   : > { %p2107_p9 = scmp.ge.s32.totalorder %s1684_s21, 2  ;;  %s1115_s6 = scalar_lea.sflag [#allocation4], %s1114_s24 }
 0x486   : > { %p1451_p12 = pnand %p2107_p9, %p2106_p7 }
 0x488   : > { %1667 = dma.done.wait (!%p1451_p12), %s1115_s6, 1024  }
 0x489   : > { %1669 = vsyncadd (!%p1451_p12), %s1115_s6, 4294966272  ;;  %p19_p1 = scmp.ge.s32.totalorder %s1844_s29, 4   ;;  %s2108_s18 = smov %s1676_s19 }
 0x48a   : > { %s2109_s19 = smov %s1680_s20  ;;  %s2110_s20 = smov %s1860_s27 }
 0x48b   : > { %s2111_s21 = smov %s1844_s29  ;;  %21 = sbr.rel (!%p19_p1) target bundleno = 6 (0x6), region = 93 }
 0x492   :  { %1120 = vsyncpa [#allocation3], 1 }
 0x493   :  { %1122 = vsyncpa [#allocation3 + $0x1], 1 }
 0x494   :  { %1123 = vsyncpa [#allocation6], 1 }
 0x495   :  { %1124 = vsyncpa [#allocation4], 1 }
 0x496   :  { %1126 = vsyncpa [#allocation4 + $0x1], 1 }

</bundles_post_ra>
